<compile_context>
chip_gen: v6e
topology: v6e:2x2x1
jax: 0.10.0
libtpu: 0.0.40
codegen_flags: <defaults>
</compile_context>

<pallas_src>
import math

import jax
import jax.numpy as jnp
from jax.experimental import pallas as pl
from jax.experimental.pallas import tpu as pltpu

_LANE = 128
_SMALL_OUTPUT_BYTES = 1 << 20      # below this, plain XLA broadcast wins
_VMEM_OUT_BUDGET = 24 << 20        # double-buffered output tiles budget (all chips)
_TB_CAP = 8192                     # max batch rows per grid step


def _round_up(x, m):
    return ((x + m - 1) // m) * m


def _bcast_kernel(u0_ref, v0_ref, u_out_ref, v_out_ref):
    # u0_ref: (1, W0p), v0_ref: (1, W1p)   -- resident rows (constant index_map)
    # u_out_ref: (TB, W0p), v_out_ref: (TB, W1p) -- lane-dense output tiles
    u_out_ref[...] = jnp.broadcast_to(u0_ref[...], u_out_ref.shape)
    v_out_ref[...] = jnp.broadcast_to(v0_ref[...], v_out_ref.shape)


def random_init_forward(x, u0, v0, *, force_pallas=False):
    """Pallas equivalent of RandomInit.forward.

    Args:
      x:  array of shape (*batch, M, N) -- only its leading batch dims matter.
      u0: (size0, rank) buffer.
      v0: (size1, rank) buffer.
      force_pallas: skip the small-problem XLA fallback (for testing).
    Returns:
      (u, v) with shapes (*batch, size0, rank) and (*batch, size1, rank).
    """
    batch_shape = x.shape[:-2]
    B = int(math.prod(batch_shape)) if batch_shape else 1
    S0, R = u0.shape
    S1, R2 = v0.shape
    assert R == R2

    out_u_shape = (*batch_shape, S0, R)
    out_v_shape = (*batch_shape, S1, R)

    W0, W1 = S0 * R, S1 * R
    itemsize = jnp.dtype(u0.dtype).itemsize
    total_bytes = B * (W0 + W1) * itemsize

    if total_bytes < _SMALL_OUTPUT_BYTES and not force_pallas:
        # Tiny problem: pallas_call launch + pipeline prologue dominates; the
        # XLA broadcast fuses into the consumer / may stay unmaterialized.
        return (jnp.broadcast_to(u0, out_u_shape),
                jnp.broadcast_to(v0, out_v_shape))

    # Lane-dense flatten; pad the flat width to a multiple of 128 so every
    # store is unmasked and every output DMA is a full contiguous row.
    W0p = _round_up(W0, _LANE)
    W1p = _round_up(W1, _LANE)
    u0_flat = jnp.pad(u0.reshape(1, W0), ((0, 0), (0, W0p - W0)))
    v0_flat = jnp.pad(v0.reshape(1, W1), ((0, 0), (0, W1p - W1)))

    # Sublane multiple for the second-to-last block dim (8 f32 / 16 bf16 / 32 i8).
    sub_mult = 8 * max(1, 4 // itemsize)

    # Pick the batch-chunk TB:
    #   * multiple of sub_mult
    #   * double-buffered output tiles fit a conservative VMEM budget
    #   * at least 2 grid steps when possible (both v7x TensorCores write)
    row_bytes = (W0p + W1p) * itemsize
    tb_vmem_cap = max(sub_mult,
                      (_VMEM_OUT_BUDGET // (2 * row_bytes)) // sub_mult * sub_mult)
    tb_cap = min(_TB_CAP, tb_vmem_cap)
    if B > tb_cap:
        TB = tb_cap
    else:
        TB = min(tb_cap, max(sub_mult, _round_up(pl.cdiv(B, 2), sub_mult)))

    # Pad B so TB divides it exactly: every grid step writes a full, unmasked,
    # contiguous tile. The padded rows are sliced off below.
    B_pad = _round_up(B, TB)
    grid = (B_pad // TB,)

    u_flat, v_flat = pl.pallas_call(
        _bcast_kernel,
        out_shape=(
            jax.ShapeDtypeStruct((B_pad, W0p), u0.dtype),
            jax.ShapeDtypeStruct((B_pad, W1p), v0.dtype),
        ),
        grid_spec=pl.GridSpec(
            grid=grid,
            in_specs=[
                pl.BlockSpec((1, W0p), lambda b: (0, 0)),
                pl.BlockSpec((1, W1p), lambda b: (0, 0)),
            ],
            out_specs=[
                pl.BlockSpec((TB, W0p), lambda b: (b, 0)),
                pl.BlockSpec((TB, W1p), lambda b: (b, 0)),
            ],
        ),
        compiler_params=pltpu.CompilerParams(
            dimension_semantics=("parallel",),
            vmem_limit_bytes=32 << 20,
        ),
    )(u0_flat, v0_flat)

    u = u_flat[:B, :W0].reshape(out_u_shape)
    v = v_flat[:B, :W1].reshape(out_v_shape)
    return u, v


if __name__ == "__main__":
    # Module config (synthetic, deterministic): rank=8, size=(16, 16),
    # method='uniform' -> nn.init.uniform_ == U[0, 1).
    rank = 8
    size = (16, 16)

    key = jax.random.PRNGKey(0)
    k_u, k_v, k_x = jax.random.split(key, 3)
    u0 = jax.random.uniform(k_u, (size[0], rank), dtype=jnp.float32)  # uniform_ init
    v0 = jax.random.uniform(k_v, (size[1], rank), dtype=jnp.float32)  # uniform_ init

    # --- 1) Small demo input (fallback path): batch (2, 4), matrix 16x16. ---
    x_small = jax.random.normal(k_x, (2, 4, size[0], size[1]), dtype=jnp.float32)
    u, v = random_init_forward(x_small, u0, v0)
    u, v = jax.block_until_ready(u), jax.block_until_ready(v)
    u_ref = jnp.broadcast_to(u0, (*x_small.shape[:-2], *u0.shape))
    v_ref = jnp.broadcast_to(v0, (*x_small.shape[:-2], *v0.shape))
    assert u.shape == (2, 4, size[0], rank) and v.shape == (2, 4, size[1], rank)
    assert jnp.array_equal(u, u_ref) and jnp.array_equal(v, v_ref)

    # --- 2) Same small input, forced through the Pallas kernel. ---
    up, vp = random_init_forward(x_small, u0, v0, force_pallas=True)
    up, vp = jax.block_until_ready(up), jax.block_until_ready(vp)
    assert jnp.array_equal(up, u_ref) and jnp.array_equal(vp, v_ref)

    # --- 3) Larger ragged batch (multi-step grid, B padding exercised). ---
    x_big = jnp.zeros((3, 700, size[0], size[1]), dtype=jnp.float32)
    ub, vb = random_init_forward(x_big, u0, v0)
    ub, vb = jax.block_until_ready(ub), jax.block_until_ready(vb)
    assert ub.shape == (3, 700, size[0], rank) and vb.shape == (3, 700, size[1], rank)
    assert jnp.array_equal(ub, jnp.broadcast_to(u0, ub.shape))
    assert jnp.array_equal(vb, jnp.broadcast_to(v0, vb.shape))

    # --- 4) Non-128-multiple flat width (lane padding exercised). ---
    u0_odd = jax.random.uniform(k_u, (10, 5), dtype=jnp.float32)   # W0 = 50
    v0_odd = jax.random.uniform(k_v, (12, 5), dtype=jnp.float32)   # W1 = 60
    uo, vo = random_init_forward(x_small, u0_odd, v0_odd, force_pallas=True)
    uo, vo = jax.block_until_ready(uo), jax.block_until_ready(vo)
    assert jnp.array_equal(uo, jnp.broadcast_to(u0_odd, (2, 4, 10, 5)))
    assert jnp.array_equal(vo, jnp.broadcast_to(v0_odd, (2, 4, 12, 5)))

    print("KERNEL_OK")
</pallas_src>

<mosaic_0001>
module attributes {stable_mosaic.version = 11 : i64} {
  func.func @_bcast_kernel(%arg0: i32, %arg1: memref<1x128xf32, #tpu.memory_space<vmem>>, %arg2: memref<1x128xf32, #tpu.memory_space<vmem>>, %arg3: memref<8x128xf32, #tpu.memory_space<vmem>>, %arg4: memref<8x128xf32, #tpu.memory_space<vmem>>) attributes {dimension_semantics = [#tpu.dimension_semantics<parallel>], iteration_bounds = array<i64: 1>, scalar_prefetch = 0 : i64, scratch_operands = 0 : i64, tpu.core_type = #tpu.core_type<tc>, window_params = [{pipeline_mode = #tpu.pipeline_mode<synchronous>, transform_indices = @transform_0, window_bounds = array<i64: 1, 128>}, {pipeline_mode = #tpu.pipeline_mode<synchronous>, transform_indices = @transform_1, window_bounds = array<i64: 1, 128>}, {transform_indices = @transform_2, window_bounds = array<i64: 8, 128>}, {transform_indices = @transform_3, window_bounds = array<i64: 8, 128>}]} {
    %c0 = arith.constant 0 : index
    %c0_0 = arith.constant 0 : index
    %0 = vector.load %arg1[%c0, %c0_0] : memref<1x128xf32, #tpu.memory_space<vmem>>, vector<1x128xf32>
    %1 = vector.shape_cast %0 : vector<1x128xf32> to vector<1x128xf32>
    %2 = vector.broadcast %1 : vector<1x128xf32> to vector<8x128xf32>
    %c0_1 = arith.constant 0 : index
    %c0_2 = arith.constant 0 : index
    %3 = vector.load %arg3[%c0_1, %c0_2] : memref<8x128xf32, #tpu.memory_space<vmem>>, vector<8x128xf32>
    tpu.vector_store %arg3[%c0_1, %c0_2], %2 {strides = array<i32>} : memref<8x128xf32, #tpu.memory_space<vmem>>, vector<8x128xf32>,
    %c0_3 = arith.constant 0 : index
    %c0_4 = arith.constant 0 : index
    %4 = vector.load %arg2[%c0_3, %c0_4] : memref<1x128xf32, #tpu.memory_space<vmem>>, vector<1x128xf32>
    %5 = vector.shape_cast %4 : vector<1x128xf32> to vector<1x128xf32>
    %6 = vector.broadcast %5 : vector<1x128xf32> to vector<8x128xf32>
    %c0_5 = arith.constant 0 : index
    %c0_6 = arith.constant 0 : index
    %7 = vector.load %arg4[%c0_5, %c0_6] : memref<8x128xf32, #tpu.memory_space<vmem>>, vector<8x128xf32>
    tpu.vector_store %arg4[%c0_5, %c0_6], %6 {strides = array<i32>} : memref<8x128xf32, #tpu.memory_space<vmem>>, vector<8x128xf32>,
    return
  }
  func.func @transform_0(%arg0: i32) -> (i32, i32) {
    %c0_i32 = arith.constant 0 : i32
    %c0_i32_0 = arith.constant 0 : i32
    %c0_i32_1 = arith.constant 0 : i32
    return %c0_i32, %c0_i32_0 : i32, i32
  }
  func.func @transform_1(%arg0: i32) -> (i32, i32) {
    %c0_i32 = arith.constant 0 : i32
    %c0_i32_0 = arith.constant 0 : i32
    %c0_i32_1 = arith.constant 0 : i32
    return %c0_i32, %c0_i32_0 : i32, i32
  }
  func.func @transform_2(%arg0: i32) -> (i32, i32) {
    %c0_i32 = arith.constant 0 : i32
    %c0_i32_0 = arith.constant 0 : i32
    return %arg0, %c0_i32 : i32, i32
  }
  func.func @transform_3(%arg0: i32) -> (i32, i32) {
    %c0_i32 = arith.constant 0 : i32
    %c0_i32_0 = arith.constant 0 : i32
    return %arg0, %c0_i32 : i32, i32
  }
}

</mosaic_0001>

<bundles_post_ra>
// kernel: tpu_custom_call.1
= control target key start
LH: loop header
LB: loop body
LE: loop exit
PB: predicated region body
PF: predicated region fallthrough
CT: control target
= control target key end

     0   :  { %9 = vsyncpa [#allocation3], 0  ;;  %s178_s0 = inlined_call_operand.hbm [shape: f32[1,128], index: 0, kind: input, shape index: {}]   ;;  %s179_s1 = inlined_call_operand.vmem [shape: f32[1,128], index: 1, kind: input, shape index: {}]   ;;  %s180_s2 = inlined_call_operand.hbm [shape: f32[8,128], index: 2, kind: output, shape index: {0}]   ;;  %s181_s3 = inlined_call_operand.hbm [shape: f32[8,128], index: 3, kind: output, shape index: {1}]  }
   0x1   :  { %10 = vsyncpa [#allocation4], 0 }
   0x2   :  { %11 = vsyncpa [#allocation7], 0  ;;  %s143_s12 = smov [#allocation2]  }
   0x3   :  { %s18_s13 = sshll.u32 %s143_s12, 4  ;;  %s19_s13 = int_to_ptr.vmem [resolvable:$true] %s18_s13 }
   0x4   :  { %s85_s14 = scalar_lea.vmem %s19_s13, 16  ;;  %s89_s15 = scalar_lea.vmem %s19_s13, 32 }
   0x5   :  { %p86_p0 = scmp.ne.s32.totalorder %s19_s13, %s85_s14  ;;  %p90_p1 = scmp.lt.s32.totalorder %s19_s13, %s19_s13 }
   0x6   :  { %p91_p2 = scmp.lt.s32.totalorder %s89_s15, %s85_s14 }
   0x8   :  { %p92_p3 = por %p91_p2, %p90_p1 }
   0xa   :  { %p93_p4 = pnand %p92_p3, %p86_p0 }
   0xc   :  { %96 = shalt.err (!%p93_p4)
}
   0xd   :  { %21 = dma.hbm_to_vmem [thread:$0]  %s178_s0, 16, %s19_s13, [#allocation3]  }
   0xe   :  { %137 = dma.done.wait [#allocation3], 16  }
   0xf   :  { %138 = vsyncadd [#allocation3], 4294967280  ;;  %s144_s18 = smov [#allocation5]   ;;  %s145_s20 = smov [#allocation6]   ;;  %v72_v0 = vld [vmem:[#allocation2] ss:$0 sm:$0xff] }
  0x10   :  { %s49_s19 = sshll.u32 %s144_s18, 4  ;;  %s59_s21 = sshll.u32 %s145_s20, 4  ;;  %v73_v1 = vld [vmem:[%s179_s1] ss:$0 sm:$0xff]  ;;  %34 = vst [vmem:[#allocation5] sm:$0xff] %v72_v0  ;;  %s50_s19 = int_to_ptr.vmem [resolvable:$true] %s49_s19  ;;  %s60_s21 = int_to_ptr.vmem [resolvable:$true] %s59_s21 }
  0x11   :  { %42 = vst [vmem:[#allocation6] sm:$0xff] %v73_v1  ;;  %s97_s24 = scalar_lea.vmem %s50_s19, 128  ;;  %p102_p6 = scmp.lt.s32.totalorder %s50_s19, %s50_s19 }
  0x12   :  { %p98_p5 = scmp.ne.s32.totalorder %s50_s19, %s97_s24  ;;  %p103_p7 = scmp.lt.s32.totalorder %s97_s24, %s97_s24 }
  0x14   :  { %p104_p8 = por %p103_p7, %p102_p6 }
  0x16   :  { %p105_p9 = pnand %p104_p8, %p98_p5 }
  0x18   :  { %108 = shalt.err (!%p105_p9)
}
  0x19   :  { %52 = dma.vmem_to_hbm [thread:$0]  %s50_s19, 128, %s180_s2, [#allocation4]  }
  0x1a   :  { %s117_s26 = scalar_lea.vmem %s60_s21, 128  ;;  %p122_p11 = scmp.lt.s32.totalorder %s60_s21, %s60_s21 }
  0x1b   :  { %p118_p10 = scmp.ne.s32.totalorder %s60_s21, %s117_s26  ;;  %p123_p12 = scmp.lt.s32.totalorder %s117_s26, %s117_s26 }
  0x1d   :  { %p124_p13 = por %p123_p12, %p122_p11 }
  0x1f   :  { %p125_p0 = pnand %p124_p13, %p118_p10 }
  0x21   :  { %128 = shalt.err (!%p125_p0)
}
  0x22   :  { %62 = dma.vmem_to_hbm [thread:$0]  %s60_s21, 128, %s181_s3, [#allocation7]  }
  0x23   :  { %139 = dma.done.wait [#allocation4], 128  }
  0x24   :  { %140 = vsyncadd [#allocation4], 4294967168 }
  0x25   :  { %141 = dma.done.wait [#allocation7], 128  }
  0x26   :  { %142 = vsyncadd [#allocation7], 4294967168 }
  0x27   :  { %69 = vsyncpa [#allocation3], 1 }
  0x28   :  { %70 = vsyncpa [#allocation4], 1 }
  0x29   :  { %71 = vsyncpa [#allocation7], 1 }

</bundles_post_ra>
